<compile_context>
chip_gen: v5e
topology: v5e:2x2
jax: 0.10.0
libtpu: 0.0.40
codegen_flags: <defaults>
</compile_context>

<pallas_src>
import numpy as np
import jax
import jax.numpy as jnp
from jax.experimental import pallas as pl
from jax.experimental.pallas import tpu as pltpu

LOG2 = float(np.log(2.0))

TILE_BYTES = 4 * 1024 * 1024            # per-ref tile byte budget per grid step
VMEM_LIMIT_BYTES = 32 * 1024 * 1024     # explicit scoped-VMEM limit (safe on all gens)
LANE_W_CANDIDATES = (2048, 1024, 512, 256, 128)  # lane-dense last-dim widths
MIN_PALLAS_ELEMS = 256 * 1024           # below this the fused-XLA path wins


def _log_cosh_kernel(pred_ref, true_ref, out_ref):
    # Upcast each operand to f32 BEFORE the subtraction (accuracy for bf16),
    # then the stable log-cosh form: |x| + log1p(exp(-2|x|)) - log(2).
    p = pred_ref[...].astype(jnp.float32)
    t = true_ref[...].astype(jnp.float32)
    x = p - t
    ax = jnp.abs(x)
    out_ref[...] = (ax + jnp.log1p(jnp.exp(-2.0 * ax)) - LOG2).astype(out_ref.dtype)


def log_cosh_loss_ref(y_pred: jax.Array, y_true: jax.Array) -> jax.Array:
    """Pure-JAX reference (matches the PyTorch module) — also the fallback path."""
    x = y_pred - y_true
    return x + jax.nn.softplus(-2.0 * x) - LOG2


def log_cosh_loss_pallas(y_pred: jax.Array, y_true: jax.Array,
                         *, min_pallas_elems: int = MIN_PALLAS_ELEMS) -> jax.Array:
    assert y_pred.shape == y_true.shape, "broadcasting not needed for this use"
    orig_shape = y_pred.shape
    out_dtype = jnp.result_type(y_pred.dtype, y_true.dtype)

    n = int(np.prod(orig_shape)) if len(orig_shape) > 0 else 1

    # Pick the widest lane-dense last dim that divides numel exactly -> zero
    # padding / slicing on the kernel path.
    lane_w = None
    for cand in LANE_W_CANDIDATES:
        if n % cand == 0:
            lane_w = cand
            break

    # Fallback: tiny tensors, or ragged sizes (numel not a multiple of 128).
    # XLA-fused elementwise is at/near roofline there and avoids copy plumbing.
    if lane_w is None or n < min_pallas_elems:
        return log_cosh_loss_ref(y_pred, y_true).astype(out_dtype)

    rows = n // lane_w
    # Reshapes of contiguous arrays are free (no HBM copy), and inputs keep
    # their native dtypes (no wrapper-side upcast copies).
    p2 = y_pred.reshape(rows, lane_w)
    t2 = y_true.reshape(rows, lane_w)

    # Fixed byte budget per grid step, independent of dtype.
    isz_p = jnp.dtype(y_pred.dtype).itemsize
    isz_t = jnp.dtype(y_true.dtype).itemsize
    isz_o = jnp.dtype(out_dtype).itemsize
    max_isz = max(isz_p, isz_t, isz_o)
    tile_rows = max(8, (TILE_BYTES // (lane_w * max_isz)) // 8 * 8)
    tile_rows = min(tile_rows, rows)     # small inputs: one full-extent block
    grid = (int(pl.cdiv(rows, tile_rows)),)   # partial edge block is masked by Pallas

    cost = pl.CostEstimate(
        flops=5 * n,
        transcendentals=2 * n,                      # exp + log1p per element
        bytes_accessed=n * (isz_p + isz_t + isz_o),  # 2 reads + 1 write, native widths
    )

    out2 = pl.pallas_call(
        _log_cosh_kernel,
        out_shape=jax.ShapeDtypeStruct((rows, lane_w), out_dtype),
        grid_spec=pltpu.PrefetchScalarGridSpec(
            num_scalar_prefetch=0,
            grid=grid,
            in_specs=[
                pl.BlockSpec((tile_rows, lane_w), lambda i: (i, 0)),
                pl.BlockSpec((tile_rows, lane_w), lambda i: (i, 0)),
            ],
            out_specs=pl.BlockSpec((tile_rows, lane_w), lambda i: (i, 0)),
        ),
        compiler_params=pltpu.CompilerParams(
            dimension_semantics=("parallel",),   # independent tiles -> v7x 2-TC split
            vmem_limit_bytes=VMEM_LIMIT_BYTES,
        ),
        cost_estimate=cost,
    )(p2, t2)

    return out2.reshape(orig_shape)   # free: (rows*lane_w) == numel, no slice needed


if __name__ == "__main__":
    key = jax.random.PRNGKey(0)
    k1, k2 = jax.random.split(key)

    # 1) Module-consistent small shape (NCHW), force the Pallas path.
    shape = (2, 4, 16, 16)            # 2048 elems -> (1, 2048) lane-dense slab
    y_pred = jax.random.normal(k1, shape, dtype=jnp.float32)
    y_true = jax.random.normal(k2, shape, dtype=jnp.float32)
    out = jax.block_until_ready(log_cosh_loss_pallas(y_pred, y_true, min_pallas_elems=0))
    np.testing.assert_allclose(np.asarray(out), np.asarray(log_cosh_loss_ref(y_pred, y_true)),
                               rtol=1e-5, atol=1e-5)

    # 2) Larger aligned shape: exercises the multi-step grid / double-buffering.
    shape_big = (4, 8, 256, 256)      # 2M elems -> rows=1024, tile_rows=512, grid=(2,)
    a = jax.random.normal(k1, shape_big, dtype=jnp.float32)
    b = jax.random.normal(k2, shape_big, dtype=jnp.float32)
    out_big = jax.block_until_ready(log_cosh_loss_pallas(a, b))
    np.testing.assert_allclose(np.asarray(out_big), np.asarray(log_cosh_loss_ref(a, b)),
                               rtol=1e-5, atol=1e-5)

    # 3) Mixed dtypes (bf16 pred, f32 true): native-dtype HBM loads, f32 in-kernel.
    y_pred_bf16 = y_pred.astype(jnp.bfloat16)
    out_mixed = jax.block_until_ready(
        log_cosh_loss_pallas(y_pred_bf16, y_true, min_pallas_elems=0))
    np.testing.assert_allclose(np.asarray(out_mixed),
                               np.asarray(log_cosh_loss_ref(y_pred_bf16, y_true)),
                               rtol=1e-5, atol=1e-5)

    # 4) Ragged size: takes the fused-XLA fallback path; still correct.
    shape_rag = (3, 5, 17, 23)
    c = jax.random.normal(k1, shape_rag, dtype=jnp.float32)
    d = jax.random.normal(k2, shape_rag, dtype=jnp.float32)
    out_rag = jax.block_until_ready(log_cosh_loss_pallas(c, d))
    np.testing.assert_allclose(np.asarray(out_rag), np.asarray(log_cosh_loss_ref(c, d)),
                               rtol=1e-5, atol=1e-5)

    print("KERNEL_OK")
</pallas_src>

<mosaic_0001>
module attributes {stable_mosaic.version = 11 : i64} {
  func.func @_log_cosh_kernel(%arg0: i32, %arg1: memref<1x2048xf32, #tpu.memory_space<vmem>>, %arg2: memref<1x2048xf32, #tpu.memory_space<vmem>>, %arg3: memref<1x2048xf32, #tpu.memory_space<vmem>>) attributes {dimension_semantics = [#tpu.dimension_semantics<parallel>], iteration_bounds = array<i64: 1>, scalar_prefetch = 0 : i64, scratch_operands = 0 : i64, tpu.core_type = #tpu.core_type<tc>, window_params = [{transform_indices = @transform_0, window_bounds = array<i64: 1, 2048>}, {transform_indices = @transform_1, window_bounds = array<i64: 1, 2048>}, {transform_indices = @transform_2, window_bounds = array<i64: 1, 2048>}]} {
    %c0 = arith.constant 0 : index
    %c0_0 = arith.constant 0 : index
    %0 = vector.load %arg1[%c0, %c0_0] : memref<1x2048xf32, #tpu.memory_space<vmem>>, vector<1x2048xf32>
    %c0_1 = arith.constant 0 : index
    %c0_2 = arith.constant 0 : index
    %1 = vector.load %arg2[%c0_1, %c0_2] : memref<1x2048xf32, #tpu.memory_space<vmem>>, vector<1x2048xf32>
    %2 = arith.subf %0, %1 : vector<1x2048xf32>
    %3 = math.absf %2 : vector<1x2048xf32>
    %cst = arith.constant -2.000000e+00 : f32
    %4 = vector.broadcast %cst : f32 to vector<1x2048xf32>
    %5 = arith.mulf %4, %3 : vector<1x2048xf32>
    %6 = math.exp %5 : vector<1x2048xf32>
    %7 = math.log1p %6 : vector<1x2048xf32>
    %8 = arith.addf %3, %7 : vector<1x2048xf32>
    %cst_3 = arith.constant 0.693147182 : f32
    %9 = vector.broadcast %cst_3 : f32 to vector<1x2048xf32>
    %10 = arith.subf %8, %9 : vector<1x2048xf32>
    %c0_4 = arith.constant 0 : index
    %c0_5 = arith.constant 0 : index
    %11 = vector.load %arg3[%c0_4, %c0_5] : memref<1x2048xf32, #tpu.memory_space<vmem>>, vector<1x2048xf32>
    tpu.vector_store %arg3[%c0_4, %c0_5], %10 {strides = array<i32>} : memref<1x2048xf32, #tpu.memory_space<vmem>>, vector<1x2048xf32>,
    return
  }
  func.func @transform_0(%arg0: i32) -> (i32, i32) {
    %c0_i32 = arith.constant 0 : i32
    %c0_i32_0 = arith.constant 0 : i32
    return %arg0, %c0_i32 : i32, i32
  }
  func.func @transform_1(%arg0: i32) -> (i32, i32) {
    %c0_i32 = arith.constant 0 : i32
    %c0_i32_0 = arith.constant 0 : i32
    return %arg0, %c0_i32 : i32, i32
  }
  func.func @transform_2(%arg0: i32) -> (i32, i32) {
    %c0_i32 = arith.constant 0 : i32
    %c0_i32_0 = arith.constant 0 : i32
    return %arg0, %c0_i32 : i32, i32
  }
}

</mosaic_0001>

<bundles_post_ra>
// kernel: tpu_custom_call.1
= control target key start
LH: loop header
LB: loop body
LE: loop exit
PB: predicated region body
PF: predicated region fallthrough
CT: control target
= control target key end

     0   :  { %7 = vsyncpa [#allocation3], 0  ;;  %s214_s0 = inlined_call_operand.hbm [shape: f32[1,2048], index: 0, kind: input, shape index: {}]   ;;  %s215_s1 = inlined_call_operand.hbm [shape: f32[1,2048], index: 1, kind: input, shape index: {}]   ;;  %s216_s2 = inlined_call_operand.hbm [shape: f32[1,2048], index: 2, kind: output, shape index: {}]  }
   0x1   :  { %8 = vsyncpa [#allocation6], 0 }
   0x2   :  { %9 = vsyncpa [#allocation4], 0  ;;  %s15_s11 = sshll.u32 %s214_s0, 4  ;;  %s187_s12 = smov [#allocation2]   ;;  %s16_s11 = int_to_ptr.hbm [resolvable:$true] %s15_s11 }
   0x3   :  { %s17_s13 = sshll.u32 %s187_s12, 4  ;;  %s26_s16 = sshll.u32 %s215_s1, 4  ;;  %s18_s13 = int_to_ptr.vmem [resolvable:$true] %s17_s13  ;;  %s27_s16 = int_to_ptr.hbm [resolvable:$true] %s26_s16 }
   0x4   :  { %20 = dma.hbm_to_vmem [thread:$0]  %s16_s11, 256, %s18_s13, [#allocation3]  }
   0x5   :  { %s188_s17 = smov [#allocation5]  }
   0x6   :  { %s28_s18 = sshll.u32 %s188_s17, 4  ;;  %s29_s18 = int_to_ptr.vmem [resolvable:$true] %s28_s18 }
   0x7   :  { %31 = dma.hbm_to_vmem [thread:$0]  %s27_s16, 256, %s29_s18, [#allocation6]  }
   0x8   :  { %181 = dma.done.wait [#allocation3], 256  }
   0x9   :  { %182 = vsyncadd [#allocation3], 4294967040 }
   0xa   :  { %183 = dma.done.wait [#allocation6], 256  }
   0xb   :  { %184 = vsyncadd [#allocation6], 4294967040  ;;  %v40_v0 = vld [vmem:[#allocation2] sm:$0xff]  ;;  %v42_v1 = vld [vmem:[#allocation5] sm:$0xff]  ;;  %s189_s0 = smov [#allocation7]   ;;  %s85_s21 = sshll.u32 %s216_s2, 4  ;;  %s86_s21 = int_to_ptr.hbm [resolvable:$true] %s85_s21 }
   0xc   :  { %v41_v2 = vld [vmem:[#allocation2 + $0x8] sm:$0xff]  ;;  %v44_v3 = vsub.f32 %v40_v0, %v42_v1  ;;  %v43_v4 = vld [vmem:[#allocation5 + $0x8] sm:$0xff]  ;;  %s83_s1 = sshll.u32 %s189_s0, 4  ;;  %s84_s1 = int_to_ptr.vmem [resolvable:$true] %s83_s1 }
   0xd   :  { %v45_v5 = vsub.f32 %v41_v2, %v43_v4 }
   0xe   :  { %v46_v6 = vand.u32 2147483647, %v44_v3 }
   0xf   :  { %v47_v7 = vand.u32 2147483647, %v45_v5 }
  0x10   :  { %v48_v8 = vmul.f32 -2.0, %v46_v6 }
  0x11   :  { %v49_v9 = vmul.f32 -2.0, %v47_v7 }
  0x12   :  { %v50_v10 = vmul.f32 1.442695, %v48_v8 }
  0x13   :  { %v52_v11 = vmul.f32 1.442695, %v49_v9 }
  0x14   :  { %101 = vpow2.f32 %v50_v10 }
  0x15   :  { %103 = vpow2.f32 %v52_v11 }
  0x1a   :  { %v102_v12 = vpop.eup %101 }
  0x1b   :  { %v104_v13 = vpop.eup %103  ;;  %v54_v14 = vadd.f32 1.0, %v102_v12  ;;  %v57_v15 = vmul.f32 -0.5, %v102_v12  ;;  %v60_v19 = vand.u32 2147483647, %v102_v12 }
  0x1c   :  { %v63_v16 = vadd.f32 1.0, %v104_v13  ;;  %v66_v17 = vmul.f32 -0.5, %v104_v13  ;;  %v69_v21 = vand.u32 2147483647, %v104_v13 }
  0x1d   :  { %105 = vlog2.f32 %v54_v14  ;;  %v58_v18 = vadd.f32 1.0, %v57_v15  ;;  %vm61_vm0 = vcmp.lt.f32.partialorder %v60_v19, 0.0004427343 }
  0x1e   :  { %107 = vlog2.f32 %v63_v16  ;;  %v67_v20 = vadd.f32 1.0, %v66_v17  ;;  %vm70_vm1 = vcmp.lt.f32.partialorder %v69_v21, 0.0004427343 }
  0x1f   :  { %v59_v22 = vmul.f32 %v102_v12, %v58_v18 }
  0x20   :  { %v68_v24 = vmul.f32 %v104_v13, %v67_v20 }
  0x23   :  { %v106_v23 = vpop.eup %105 }
  0x24   :  { %v108_v25 = vpop.eup %107  ;;  %v56_v26 = vmul.f32 0.6931472, %v106_v23 }
  0x25   :  { %v65_v27 = vmul.f32 0.6931472, %v108_v25 }
  0x26   :  { %v62_v28 = vsel %vm61_vm0, %v59_v22, %v56_v26 }
  0x27   :  { %v72_v29 = vadd.f32 %v62_v28, %v46_v6  ;;  %v71_v30 = vsel %vm70_vm1, %v68_v24, %v65_v27 }
  0x28   :  { %v73_v31 = vadd.f32 %v71_v30, %v47_v7 }
  0x29   :  { %v96_v32 = vadd.f32 -0.6931472, %v72_v29 }
  0x2a   :  { %v97_v33 = vadd.f32 -0.6931472, %v73_v31 }
  0x2b   :  { %76 = vst [vmem:[#allocation7] sm:$0xff] %v96_v32 }
  0x2c   :  { %77 = vst [vmem:[#allocation7 + $0x8] sm:$0xff] %v97_v33 }
  0x2d   :  { %88 = dma.vmem_to_hbm [thread:$0]  %s84_s1, 256, %s86_s21, [#allocation4]  }
  0x2e   :  { %185 = dma.done.wait [#allocation4], 256  }
  0x2f   :  { %186 = vsyncadd [#allocation4], 4294967040 }
  0x30   :  { %93 = vsyncpa [#allocation3], 1 }
  0x31   :  { %94 = vsyncpa [#allocation6], 1 }
  0x32   :  { %95 = vsyncpa [#allocation4], 1 }

</bundles_post_ra>
